<compile_context>
chip_gen: v6e
topology: v6e:2x2x1
jax: 0.10.0
libtpu: 0.0.40
codegen_flags: <defaults>
</compile_context>

<pallas_src>
import jax
import jax.numpy as jnp
from jax.experimental import pallas as pl
from jax.experimental.pallas import tpu as pltpu


def _round_up(n, m):
    return ((n + m - 1) // m) * m


def clf_aad_kernel(x_ref, w_ref, b_ref, o_ref):
    """One fused affine (MXU) + tanh-sigmoid epilogue for the 2-class softmax.

    x_ref: (tb, class_dim)   input rows (f32 or bf16)
    w_ref: (class_dim, 128)  col 0 = -w_half, col 1 = +w_half, remaining lanes zero
    b_ref: (1, 2)            [-b_half, +b_half], f32
    o_ref: (tb, 2)           class probabilities, f32
    """
    acc = jnp.dot(x_ref[...], w_ref[...], preferred_element_type=jnp.float32)  # (tb, 128)
    half_ld = acc[:, 0:2] + b_ref[...]   # (tb, 2): [-(l1 - l0)/2, +(l1 - l0)/2]
    # softmax over 2 classes == sigmoid of the logit difference:
    #   p1 = 0.5 * (1 + tanh((l1-l0)/2)),  p0 = 0.5 * (1 - tanh((l1-l0)/2)) = 1 - p1
    o_ref[...] = (0.5 + 0.5 * jnp.tanh(half_ld)).astype(o_ref.dtype)


def clf_aad_forward(x, params, *, tb_max=8192):
    """ClfAAD forward (eval mode).

    x:      (B, class_dim) float32 or bfloat16.
    params: transposed weights w1 (class_dim,64), w2 (64,32), w3 (32,2); biases b1/b2/b3 (1,·).
    Returns (B, 2) float32 class probabilities.
    """
    B, class_dim = x.shape
    itemsize = x.dtype.itemsize

    # ---- Collapse the three Linears once (tiny one-off XLA ops).  Valid in eval mode only. ----
    w_eff = params["w1"] @ params["w2"] @ params["w3"]                                   # (K, 2)
    b_eff = (params["b1"] @ params["w2"] + params["b2"]) @ params["w3"] + params["b3"]   # (1, 2)
    w_half = 0.5 * (w_eff[:, 1] - w_eff[:, 0])                                           # (K,)
    b_half = 0.5 * (b_eff[0, 1] - b_eff[0, 0])                                           # scalar
    # +/- half-difference columns, zero-padded to a full 128-lane MXU tile (free: N pads to 128
    # in the MXU anyway; keeps the matmul at the most vanilla shape).
    w_pm = jnp.zeros((class_dim, 128), x.dtype)
    w_pm = w_pm.at[:, 0].set((-w_half).astype(x.dtype))
    w_pm = w_pm.at[:, 1].set(w_half.astype(x.dtype))
    b_pm = jnp.stack([-b_half, b_half]).reshape(1, 2).astype(jnp.float32)

    # ---- Batch tiling: big tiles, >= 2 grid steps for v7x megacore, explicit VMEM budget. ----
    lanes_in = _round_up(class_dim, 128)
    # 2 double-buffered x tiles + 2 double-buffered (lane-padded) out tiles + epilogue temps.
    bytes_per_row = 2 * lanes_in * itemsize + 5 * 128 * 4
    tb_vmem_cap = max(8, ((44 << 20) // bytes_per_row) // 8 * 8)
    tb = min(int(tb_max), _round_up(pl.cdiv(B, 2), 8), tb_vmem_cap)
    if tb >= B:
        tb = B  # single block covering the whole (possibly non-8-aligned) batch
    grid = (pl.cdiv(B, tb),)

    vmem_bytes = tb * bytes_per_row + (2 << 20)
    vmem_limit = int(min(max(vmem_bytes, 16 << 20), 56 << 20))

    out = pl.pallas_call(
        clf_aad_kernel,
        out_shape=jax.ShapeDtypeStruct((B, 2), jnp.float32),
        grid_spec=pltpu.PrefetchScalarGridSpec(
            num_scalar_prefetch=0,
            grid=grid,
            in_specs=[
                pl.BlockSpec((tb, class_dim), lambda i: (i, 0)),    # streamed x tile
                pl.BlockSpec((class_dim, 128), lambda i: (0, 0)),   # resident +/- weight columns
                pl.BlockSpec((1, 2), lambda i: (0, 0)),             # resident +/- bias
            ],
            out_specs=pl.BlockSpec((tb, 2), lambda i: (i, 0)),
        ),
        compiler_params=pltpu.CompilerParams(
            dimension_semantics=("parallel",),   # shard batch tiles across TCs (v7x megacore)
            vmem_limit_bytes=vmem_limit,
        ),
    )(x, w_pm, b_pm)
    return out


def init_params(key, class_dim):
    """Deterministic init mimicking PyTorch Linear (uniform +-1/sqrt(fan_in)).
    Weights stored transposed: (in_features, out_features)."""
    dims = [(class_dim, 64), (64, 32), (32, 2)]
    params = {}
    for i, (fan_in, fan_out) in enumerate(dims, start=1):
        key, kw, kb = jax.random.split(key, 3)
        bound = 1.0 / (fan_in ** 0.5)
        params[f"w{i}"] = jax.random.uniform(
            kw, (fan_in, fan_out), jnp.float32, minval=-bound, maxval=bound
        )
        params[f"b{i}"] = jax.random.uniform(
            kb, (1, fan_out), jnp.float32, minval=-bound, maxval=bound
        )
    return params


def reference_forward(x, params):
    """Pure-JAX reference using the original (un-collapsed) three-layer form."""
    h1 = x @ params["w1"] + params["b1"]
    h2 = h1 @ params["w2"] + params["b2"]
    logits = h2 @ params["w3"] + params["b3"]
    return jax.nn.softmax(logits, axis=-1)


if __name__ == "__main__":
    key = jax.random.PRNGKey(0)
    class_dim = 32   # flags.class_dim
    batch = 2

    k_params, k_x, k_x2 = jax.random.split(key, 3)
    params = init_params(k_params, class_dim)

    # Tolerances: 2e-3 because the TPU's default f32 matmul precision (operand truncation) can
    # differ between the collapsed 1-matmul kernel and the 3-matmul XLA reference.
    # Primary check: small batch (single partial block, 2 rows).
    x = jax.random.normal(k_x, (batch, class_dim), dtype=jnp.float32)
    out = jax.block_until_ready(clf_aad_forward(x, params))
    ref = reference_forward(x, params)
    assert out.shape == (batch, 2)
    assert jnp.allclose(out, ref, atol=2e-3, rtol=2e-3), "mismatch (small batch)"
    assert jnp.allclose(jnp.sum(out, axis=-1), 1.0, atol=1e-5)

    # Secondary check: multi-step grid + masked ragged edge block (300 rows, 128-row tiles).
    x2 = jax.random.normal(k_x2, (300, class_dim), dtype=jnp.float32)
    out2 = jax.block_until_ready(clf_aad_forward(x2, params, tb_max=128))
    ref2 = reference_forward(x2, params)
    assert out2.shape == (300, 2)
    assert jnp.allclose(out2, ref2, atol=2e-3, rtol=2e-3), "mismatch (tiled batch)"
    assert jnp.allclose(jnp.sum(out2, axis=-1), 1.0, atol=1e-5)

    print("KERNEL_OK")
</pallas_src>

<mosaic_0001>
module attributes {stable_mosaic.version = 11 : i64} {
  func.func @clf_aad_kernel(%arg0: i32, %arg1: memref<2x32xf32, #tpu.memory_space<vmem>>, %arg2: memref<32x128xf32, #tpu.memory_space<vmem>>, %arg3: memref<1x2xf32, #tpu.memory_space<vmem>>, %arg4: memref<2x2xf32, #tpu.memory_space<vmem>>) attributes {dimension_semantics = [#tpu.dimension_semantics<parallel>], iteration_bounds = array<i64: 1>, scalar_prefetch = 0 : i64, scratch_operands = 0 : i64, tpu.core_type = #tpu.core_type<tc>, window_params = [{transform_indices = @transform_0, window_bounds = array<i64: 2, 32>}, {pipeline_mode = #tpu.pipeline_mode<synchronous>, transform_indices = @transform_1, window_bounds = array<i64: 32, 128>}, {pipeline_mode = #tpu.pipeline_mode<synchronous>, transform_indices = @transform_2, window_bounds = array<i64: 1, 2>}, {transform_indices = @transform_3, window_bounds = array<i64: 2, 2>}]} {
    %c0 = arith.constant 0 : index
    %c0_0 = arith.constant 0 : index
    %0 = vector.load %arg1[%c0, %c0_0] : memref<2x32xf32, #tpu.memory_space<vmem>>, vector<2x32xf32>
    %c0_1 = arith.constant 0 : index
    %c0_2 = arith.constant 0 : index
    %1 = vector.load %arg2[%c0_1, %c0_2] : memref<32x128xf32, #tpu.memory_space<vmem>>, vector<32x128xf32>
    %cst = arith.constant dense<0.000000e+00> : vector<2x128xf32>
    %2 = tpu.matmul %0, %1, %cst {dimension_numbers = #tpu.dot_dimension_numbers<[1], [0], [0], [1], [0, 0, 1, 1], [], []>} : vector<2x32xf32>, vector<32x128xf32>, vector<2x128xf32> -> vector<2x128xf32>
    %3 = vector.extract_strided_slice %2 {offsets = [0, 0], sizes = [2, 2], strides = [1, 1]} : vector<2x128xf32> to vector<2x2xf32>
    %c0_3 = arith.constant 0 : index
    %c0_4 = arith.constant 0 : index
    %4 = vector.load %arg3[%c0_3, %c0_4] : memref<1x2xf32, #tpu.memory_space<vmem>>, vector<1x2xf32>
    %5 = vector.broadcast %4 : vector<1x2xf32> to vector<2x2xf32>
    %6 = arith.addf %3, %5 : vector<2x2xf32>
    %7 = math.tanh %6 : vector<2x2xf32>
    %cst_5 = arith.constant 5.000000e-01 : f32
    %8 = vector.broadcast %cst_5 : f32 to vector<2x2xf32>
    %9 = arith.mulf %8, %7 : vector<2x2xf32>
    %cst_6 = arith.constant 5.000000e-01 : f32
    %10 = vector.broadcast %cst_6 : f32 to vector<2x2xf32>
    %11 = arith.addf %10, %9 : vector<2x2xf32>
    %c0_7 = arith.constant 0 : index
    %c0_8 = arith.constant 0 : index
    %12 = vector.load %arg4[%c0_7, %c0_8] : memref<2x2xf32, #tpu.memory_space<vmem>>, vector<2x2xf32>
    tpu.vector_store %arg4[%c0_7, %c0_8], %11 {strides = array<i32>} : memref<2x2xf32, #tpu.memory_space<vmem>>, vector<2x2xf32>,
    return
  }
  func.func @transform_0(%arg0: i32) -> (i32, i32) {
    %c0_i32 = arith.constant 0 : i32
    %c0_i32_0 = arith.constant 0 : i32
    return %arg0, %c0_i32 : i32, i32
  }
  func.func @transform_1(%arg0: i32) -> (i32, i32) {
    %c0_i32 = arith.constant 0 : i32
    %c0_i32_0 = arith.constant 0 : i32
    %c0_i32_1 = arith.constant 0 : i32
    return %c0_i32, %c0_i32_0 : i32, i32
  }
  func.func @transform_2(%arg0: i32) -> (i32, i32) {
    %c0_i32 = arith.constant 0 : i32
    %c0_i32_0 = arith.constant 0 : i32
    %c0_i32_1 = arith.constant 0 : i32
    return %c0_i32, %c0_i32_0 : i32, i32
  }
  func.func @transform_3(%arg0: i32) -> (i32, i32) {
    %c0_i32 = arith.constant 0 : i32
    %c0_i32_0 = arith.constant 0 : i32
    return %arg0, %c0_i32 : i32, i32
  }
}

</mosaic_0001>

<bundles_post_ra>
// kernel: tpu_custom_call.1
= control target key start
LH: loop header
LB: loop body
LE: loop exit
PB: predicated region body
PF: predicated region fallthrough
CT: control target
= control target key end

     0   :  { %8 = vsyncpa [#allocation3], 0  ;;  %s281_s0 = inlined_call_operand.hbm [shape: f32[2,32], index: 0, kind: input, shape index: {}]   ;;  %s282_s1 = inlined_call_operand.hbm [shape: f32[32,128], index: 1, kind: input, shape index: {}]   ;;  %s283_s2 = inlined_call_operand.vmem [shape: f32[1,2], index: 2, kind: input, shape index: {}]   ;;  %s284_s3 = inlined_call_operand.hbm [shape: f32[2,2], index: 3, kind: output, shape index: {}]  }
   0x1   :  { %9 = vsyncpa [#allocation6], 0 }
   0x2   :  { %10 = vsyncpa [#allocation4], 0  ;;  %s242_s12 = smov [#allocation2]   ;;  %s243_s14 = smov [#allocation5]  }
   0x3   :  { %s17_s13 = sshll.u32 %s242_s12, 4  ;;  %s26_s15 = sshll.u32 %s243_s14, 4  ;;  %s18_s13 = int_to_ptr.vmem [resolvable:$true] %s17_s13  ;;  %s27_s15 = int_to_ptr.vmem [resolvable:$true] %s26_s15 }
   0x4   :  { %s184_s16 = scalar_lea.vmem %s18_s13, 32  ;;  %p189_p1 = scmp.lt.s32.totalorder %s18_s13, %s18_s13 }
   0x5   :  { %p185_p0 = scmp.ne.s32.totalorder %s18_s13, %s184_s16  ;;  %p190_p2 = scmp.lt.s32.totalorder %s184_s16, %s184_s16 }
   0x7   :  { %p191_p3 = por %p190_p2, %p189_p1 }
   0x9   :  { %p192_p4 = pnand %p191_p3, %p185_p0 }
   0xb   :  { %195 = shalt.err (!%p192_p4)
}
   0xc   :  { %20 = dma.hbm_to_vmem [thread:$0]  %s281_s0, 32, %s18_s13, [#allocation3]  }
   0xd   :  { %s204_s19 = scalar_lea.vmem %s27_s15, 512  ;;  %p209_p6 = scmp.lt.s32.totalorder %s27_s15, %s27_s15 }
   0xe   :  { %p205_p5 = scmp.ne.s32.totalorder %s27_s15, %s204_s19  ;;  %p210_p7 = scmp.lt.s32.totalorder %s204_s19, %s204_s19 }
  0x10   :  { %p211_p8 = por %p210_p7, %p209_p6 }
  0x12   :  { %p212_p9 = pnand %p211_p8, %p205_p5 }
  0x14   :  { %215 = shalt.err (!%p212_p9)
}
  0x15   :  { %s244_s20 = smov 128   ;;  %s245_s21 = smov 8  }
  0x16   :  { %32 = dma.hbm_to_vmem [thread:$0]  %s282_s1, 512, %s27_s15, [#allocation6], %s244_s20, %s244_s20, %s245_s21  }
  0x17   :  { %236 = dma.done.wait [#allocation3], 32  }
  0x18   :  { %237 = vsyncadd [#allocation3], 4294967264 }
  0x19   :  { %238 = dma.done.wait [#allocation6], 512  }
  0x1a   :  { %239 = vsyncadd [#allocation6], 4294966784  ;;  %v246_v0 = vmov 0.0   ;;  %vm247_vm0 = vmmov 0   ;;  %v45_v1 = vld [vmem:[#allocation5 + $0x18] sm:$0xff]  ;;  %v44_v2 = vld [vmem:[#allocation5 + $0x10] sm:$0xff] }
  0x1b   :  { %156 = vmatprep.subr.mxu0 %v246_v0  ;;  %164 = vmatprep.mubr.msk.f32.mxu0 %vm247_vm0, %v246_v0  ;;  %v43_v3 = vld [vmem:[#allocation5 + $0x8] sm:$0xff]  ;;  %v42_v4 = vld [vmem:[#allocation5] sm:$0xff]  ;;  %v41_v5 = vld [vmem:[#allocation2] sm:$0x3]  ;;  %vm46_vm1 = vcmask 261120   ;;  %s248_s24 = smov [#allocation7]  }
  0x1c   :  { %157 = vmatpush3.msra.mxu0 %v45_v1  ;;  %v150_v6 = vld [vmem:[%s283_s2] ss:$0 sm:$0xff]  ;;  %s139_s25 = sshll.u32 %s248_s24, 4  ;;  %vm131_vm2 = vcmask 9216   ;;  %s140_s25 = int_to_ptr.vmem [resolvable:$true] %s139_s25 }
  0x1d   :  { %158 = vmatprep.subr.mxu0 %v246_v0  ;;  %s216_s26 = scalar_lea.vmem %s140_s25, 32  ;;  %p221_p11 = scmp.lt.s32.totalorder %s140_s25, %s140_s25 }
  0x1e   :  { %159 = vmatpush3.msra.mxu0 %v44_v2  ;;  %p217_p10 = scmp.ne.s32.totalorder %s140_s25, %s216_s26  ;;  %p222_p12 = scmp.lt.s32.totalorder %s216_s26, %s216_s26 }
  0x1f   :  { %160 = vmatprep.subr.mxu0 %v246_v0 }
  0x20   :  { %161 = vmatpush3.msra.mxu0 %v43_v3  ;;  %p223_p13 = por %p222_p12, %p221_p11 }
  0x21   :  { %162 = vmatprep.subr.mxu0 %v246_v0 }
  0x22   :  { %163 = vmatpush3.msra.mxu0 %v42_v4  ;;  %p224_p0 = pnand %p223_p13, %p217_p10 }
  0x23   :  { %165 = vmatmul.mubr.msk.f32.vlgmr.msra.gmra.mxu0 %vm46_vm1, %v41_v5 }
  0xe3   :  { %v116_v7 = vpop.f32.mrf.mxu0 }
  0xe4   :  { %v127_v8 = vadd.f32 %v150_v6, %v116_v7 }
  0xe5   :  { %v166_v9 = vpop.f32.mrf.mxu0 }
  0xe6   :  { %174 = vtanh.f32 %v127_v8 }
  0xf3   :  { %v175_v10 = vpop.eup %174 }
  0xf4   :  { %v129_v11 = vmul.f32 0.5, %v175_v10 }
  0xf6   :  { %v130_v12 = vadd.f32 0.5, %v129_v11 }
  0xf8   :  { %132 = vst.msk [vmem:[#allocation7] sm:$0x3] %vm131_vm2, %v130_v12 }
  0xf9   :  { %227 = shalt.err (!%p224_p0)
}
  0xfa   :  { %142 = dma.vmem_to_hbm [thread:$0]  %s140_s25, 32, %s284_s3, [#allocation4]  }
  0xfb   :  { %240 = dma.done.wait [#allocation4], 32  }
  0xfc   :  { %241 = vsyncadd [#allocation4], 4294967264 }
  0xfd   :  { %146 = vsyncpa [#allocation3], 1 }
  0xfe   :  { %147 = vsyncpa [#allocation6], 1 }
  0xff   :  { %148 = vsyncpa [#allocation4], 1 }

</bundles_post_ra>
